<compile_context>
chip_gen: v5e
topology: v5e:2x2
jax: 0.10.0
libtpu: 0.0.40
codegen_flags: <defaults>
</compile_context>

<pallas_src>
import functools

import jax
import jax.numpy as jnp
from jax import lax
from jax.experimental import pallas as pl
from jax.experimental.pallas import tpu as pltpu

TEMPERATURE = 0.1
LAMBDA_CS_REG = 0.5
_NORM_EPS = 1e-12


def _l2norm_f32(x):
    # F.normalize(x, p=2, dim=1) with eps, square-sum in f32.
    x = x.astype(jnp.float32)
    ss = jnp.sum(x * x, axis=1, keepdims=True)
    return x * lax.rsqrt(jnp.maximum(ss, _NORM_EPS * _NORM_EPS))


def _cs_loss_kernel(eng_ref, etok_ref, ktoe_ref, kor_ref, re_ref, rk_ref,
                    con_ref, reg_ref, *, tb, bsz, inv_t):
    """Per query-row tile: per-sample contrastive terms + per-sample CS-reg."""
    r = pl.multiple_of(pl.program_id(0) * tb, tb)   # first batch row of this tile

    # ---- column side: all B rows of the 4 embeddings, normalized in f32,
    #      cast to bf16 for the MXU.
    e_cols = _l2norm_f32(eng_ref[...])
    k_cols = _l2norm_f32(kor_ref[...])
    t_cols = _l2norm_f32(etok_ref[...])
    o_cols = _l2norm_f32(ktoe_ref[...])
    c_bf = jnp.concatenate(
        [e_cols.astype(jnp.bfloat16), k_cols.astype(jnp.bfloat16),
         t_cols.astype(jnp.bfloat16), o_cols.astype(jnp.bfloat16)], axis=0)

    # ---- anchor side: this tile's rows; f32 kept for positives / reg term,
    #      bf16 (with 1/t folded in) for the matmul.
    ea = _l2norm_f32(eng_ref[pl.ds(r, tb), :])
    ka = _l2norm_f32(kor_ref[pl.ds(r, tb), :])
    ta = _l2norm_f32(etok_ref[pl.ds(r, tb), :])
    oa = _l2norm_f32(ktoe_ref[pl.ds(r, tb), :])
    eas = ea * inv_t
    kas = ka * inv_t
    a_bf = jnp.concatenate([eas.astype(jnp.bfloat16), kas.astype(jnp.bfloat16)],
                           axis=0)                              # (2*tb, D)

    # ---- one fused similarity slab on the MXU: (2*tb, 4B) f32 logits.
    s = lax.dot_general(a_bf, c_bf, (((1,), (1,)), ((), ())),
                        preferred_element_type=jnp.float32)

    # ---- negatives: exp over the whole slab, zero every own-sample column
    #      (column j == anchor batch index in each of the 4 blocks) with one
    #      where built from 4 lane-wise compares — no lane-unaligned slicing.
    rows = lax.broadcasted_iota(jnp.int32, (2 * tb, 4 * bsz), 0)
    cols = lax.broadcasted_iota(jnp.int32, (2 * tb, 4 * bsz), 1)
    anchor = jnp.where(rows >= tb, rows - tb, rows) + r   # global batch idx of anchor
    self_mask = ((cols == anchor) | (cols == anchor + bsz)
                 | (cols == anchor + 2 * bsz) | (cols == anchor + 3 * bsz))
    neg = jnp.sum(jnp.where(self_mask, 0.0, jnp.exp(s)), axis=1, keepdims=True)
    neg_e = neg[:tb]                               # (tb, 1)
    neg_k = neg[tb:]                               # (tb, 1)

    # ---- positives as row-wise dots (tb x D, f32).  diag(KE) == diag(EK).
    d_ek = jnp.sum(eas * ka, axis=1, keepdims=True)
    d_et = jnp.sum(eas * ta, axis=1, keepdims=True)
    d_eo = jnp.sum(eas * oa, axis=1, keepdims=True)
    d_kt = jnp.sum(kas * ta, axis=1, keepdims=True)
    d_ko = jnp.sum(kas * oa, axis=1, keepdims=True)
    num_e = jnp.exp(d_et) + jnp.exp(d_eo) + jnp.exp(d_ek)
    num_k = jnp.exp(d_kt) + jnp.exp(d_ko) + jnp.exp(d_ek)

    con_ref[...] = (-jnp.log(num_e / (num_e + neg_e))
                    - jnp.log(num_k / (num_k + neg_k)))

    # ---- code-switch regularization on the tile's normalized rows (f32).
    re = re_ref[...]                               # (tb, 1)
    rk = rk_ref[...]
    etok_tgt = re * ea + (1.0 - re) * ka
    ktoe_tgt = rk * ka + (1.0 - rk) * ea
    reg_ref[...] = (
        jnp.sqrt(jnp.sum((ta - etok_tgt) ** 2, axis=1, keepdims=True))
        + jnp.sqrt(jnp.sum((oa - ktoe_tgt) ** 2, axis=1, keepdims=True)))


def _pick_block_rows(batch, max_rows=128):
    if batch % 8 != 0:
        return batch                # single full block (always a legal block shape)
    tb = min(max_rows, batch)
    tb -= tb % 8
    while batch % tb != 0:
        tb -= 8
    return tb


def refined_code_switch_loss(embeddings_dict, cs_ratios=None,
                             temperature=TEMPERATURE,
                             lambda_cs_reg=LAMBDA_CS_REG,
                             block_rows=None):
    # NOTE: embeddings are passed through in their native dtype (pass bf16 to
    # halve the HBM->VMEM DMA); normalization math is done in f32 in-kernel.
    eng = embeddings_dict['english']
    etok = embeddings_dict['etok']
    ktoe = embeddings_dict['ktoe']
    kor = embeddings_dict['korean']
    B, D = eng.shape

    if cs_ratios is not None:
        re = jnp.asarray(cs_ratios[0], jnp.float32).reshape(B, 1)
        rk = jnp.asarray(cs_ratios[1], jnp.float32).reshape(B, 1)
    else:
        re = jnp.zeros((B, 1), jnp.float32)
        rk = jnp.zeros((B, 1), jnp.float32)

    tb = block_rows if block_rows is not None else _pick_block_rows(B)
    assert B % tb == 0, (B, tb)
    grid = (B // tb,)

    full_spec = pl.BlockSpec((B, D), lambda i: (0, 0))   # column side, resident
    col1_spec = pl.BlockSpec((tb, 1), lambda i: (i, 0))  # per-tile (tb, 1) columns

    con, reg = pl.pallas_call(
        functools.partial(_cs_loss_kernel, tb=tb, bsz=B,
                          inv_t=float(1.0 / temperature)),
        grid=grid,
        in_specs=[full_spec, full_spec, full_spec, full_spec,
                  col1_spec, col1_spec],
        out_specs=(col1_spec, col1_spec),
        out_shape=(jax.ShapeDtypeStruct((B, 1), jnp.float32),
                   jax.ShapeDtypeStruct((B, 1), jnp.float32)),
        compiler_params=pltpu.CompilerParams(
            dimension_semantics=("parallel",),      # shards tiles across v7x TCs
            vmem_limit_bytes=48 * 1024 * 1024),
    )(eng, etok, ktoe, kor, re, rk)

    contrastive_loss = jnp.sum(con) / (2.0 * B)
    if cs_ratios is not None:
        cs_reg_loss = jnp.sum(reg) / B
    else:
        cs_reg_loss = jnp.float32(0.0)
    total_loss = contrastive_loss + lambda_cs_reg * cs_reg_loss
    components = {
        'contrastive_loss': contrastive_loss,
        'cs_reg_loss': cs_reg_loss,
        'total_loss': total_loss,
    }
    return total_loss, components


def _reference_loss(embeddings_dict, cs_ratios, temperature=TEMPERATURE,
                    lambda_cs_reg=LAMBDA_CS_REG):
    """Pure-JAX f32 reference mirroring the PyTorch per-sample loops."""
    E = _l2norm_f32(embeddings_dict['english'])
    T = _l2norm_f32(embeddings_dict['etok'])
    O = _l2norm_f32(embeddings_dict['ktoe'])
    K = _l2norm_f32(embeddings_dict['korean'])
    B = E.shape[0]
    t = temperature
    hi = jax.lax.Precision.HIGHEST
    s = lambda a, c: jnp.dot(a, c.T, precision=hi) / t
    eye = jnp.eye(B, dtype=jnp.float32)
    off = 1.0 - eye
    d = jnp.diag
    num_e = jnp.exp(d(s(E, T))) + jnp.exp(d(s(E, O))) + jnp.exp(d(s(E, K)))
    neg_e = jnp.sum((jnp.exp(s(E, E)) + jnp.exp(s(E, K)) +
                     jnp.exp(s(E, T)) + jnp.exp(s(E, O))) * off, axis=1)
    num_k = jnp.exp(d(s(K, T))) + jnp.exp(d(s(K, O))) + jnp.exp(d(s(K, E)))
    neg_k = jnp.sum((jnp.exp(s(K, E)) + jnp.exp(s(K, K)) +
                     jnp.exp(s(K, T)) + jnp.exp(s(K, O))) * off, axis=1)
    con = jnp.sum(-jnp.log(num_e / (num_e + neg_e))
                  - jnp.log(num_k / (num_k + neg_k))) / (2.0 * B)
    re, rk = cs_ratios
    re = re.reshape(B, 1)
    rk = rk.reshape(B, 1)
    etok_reg = jnp.linalg.norm(T - (re * E + (1 - re) * K), axis=1)
    ktoe_reg = jnp.linalg.norm(O - (rk * K + (1 - rk) * E), axis=1)
    reg = jnp.sum(etok_reg + ktoe_reg) / B
    return con + lambda_cs_reg * reg, con, reg


if __name__ == "__main__":
    B, D = 16, 128   # small but layout-aligned: 2 query-row tiles of 8, lane-width D
    key = jax.random.PRNGKey(0)
    k1, k2, k3, k4, k5, k6 = jax.random.split(key, 6)
    embeddings = {
        'english': jax.random.normal(k1, (B, D), jnp.float32),
        'etok':    jax.random.normal(k2, (B, D), jnp.float32),
        'ktoe':    jax.random.normal(k3, (B, D), jnp.float32),
        'korean':  jax.random.normal(k4, (B, D), jnp.float32),
    }
    cs_ratios = (jax.random.uniform(k5, (B,), jnp.float32),
                 jax.random.uniform(k6, (B,), jnp.float32))

    total, comps = refined_code_switch_loss(embeddings, cs_ratios, block_rows=8)
    total = jax.block_until_ready(total)

    ref_total, ref_con, ref_reg = _reference_loss(embeddings, cs_ratios)
    # Tolerances loosened vs. the f32 reference because the negatives matmul
    # inputs are bf16 (positives / exp / log / reduction math stays f32).
    assert jnp.allclose(total, ref_total, rtol=2e-2, atol=2e-2), (total, ref_total)
    assert jnp.allclose(comps['contrastive_loss'], ref_con, rtol=2e-2, atol=2e-2), (
        comps['contrastive_loss'], ref_con)
    assert jnp.allclose(comps['cs_reg_loss'], ref_reg, rtol=1e-4, atol=1e-5), (
        comps['cs_reg_loss'], ref_reg)

    # Also exercise the cs_ratios=None path.
    total_nr, comps_nr = refined_code_switch_loss(embeddings, None, block_rows=8)
    jax.block_until_ready(total_nr)
    assert jnp.allclose(comps_nr['cs_reg_loss'], 0.0)

    print("KERNEL_OK")
</pallas_src>

<mosaic_0001>
module attributes {stable_mosaic.version = 11 : i64} {
  func.func @_cs_loss_kernel(%arg0: i32, %arg1: memref<16x128xf32, #tpu.memory_space<vmem>>, %arg2: memref<16x128xf32, #tpu.memory_space<vmem>>, %arg3: memref<16x128xf32, #tpu.memory_space<vmem>>, %arg4: memref<16x128xf32, #tpu.memory_space<vmem>>, %arg5: memref<8x1xf32, #tpu.memory_space<vmem>>, %arg6: memref<8x1xf32, #tpu.memory_space<vmem>>, %arg7: memref<8x1xf32, #tpu.memory_space<vmem>>, %arg8: memref<8x1xf32, #tpu.memory_space<vmem>>) attributes {dimension_semantics = [#tpu.dimension_semantics<parallel>], iteration_bounds = array<i64: 2>, scalar_prefetch = 0 : i64, scratch_operands = 0 : i64, tpu.core_type = #tpu.core_type<tc>, window_params = [{pipeline_mode = #tpu.pipeline_mode<synchronous>, transform_indices = @transform_0, window_bounds = array<i64: 16, 128>}, {pipeline_mode = #tpu.pipeline_mode<synchronous>, transform_indices = @transform_1, window_bounds = array<i64: 16, 128>}, {pipeline_mode = #tpu.pipeline_mode<synchronous>, transform_indices = @transform_2, window_bounds = array<i64: 16, 128>}, {pipeline_mode = #tpu.pipeline_mode<synchronous>, transform_indices = @transform_3, window_bounds = array<i64: 16, 128>}, {transform_indices = @transform_4, window_bounds = array<i64: 8, 1>}, {transform_indices = @transform_5, window_bounds = array<i64: 8, 1>}, {transform_indices = @transform_6, window_bounds = array<i64: 8, 1>}, {transform_indices = @transform_7, window_bounds = array<i64: 8, 1>}]} {
    %c8_i32 = arith.constant 8 : i32
    %0 = arith.muli %arg0, %c8_i32 : i32
    %1 = tpu.assume_multiple %0, 8 : i32
    %c0 = arith.constant 0 : index
    %c0_0 = arith.constant 0 : index
    %2 = vector.load %arg1[%c0, %c0_0] : memref<16x128xf32, #tpu.memory_space<vmem>>, vector<16x128xf32>
    %3 = arith.mulf %2, %2 : vector<16x128xf32>
    %cst = arith.constant dense<0.000000e+00> : vector<16xf32>
    %4 = vector.multi_reduction <add>, %3, %cst [1] : vector<16x128xf32> to vector<16xf32>
    %5 = vector.shape_cast %4 : vector<16xf32> to vector<16x1xf32>
    %cst_1 = arith.constant 1.000000e-24 : f32
    %6 = vector.broadcast %cst_1 : f32 to vector<16x1xf32>
    %7 = arith.maximumf %5, %6 : vector<16x1xf32>
    %8 = math.rsqrt %7 : vector<16x1xf32>
    %9 = vector.broadcast %8 : vector<16x1xf32> to vector<16x128xf32>
    %10 = arith.mulf %2, %9 : vector<16x128xf32>
    %c0_2 = arith.constant 0 : index
    %c0_3 = arith.constant 0 : index
    %11 = vector.load %arg4[%c0_2, %c0_3] : memref<16x128xf32, #tpu.memory_space<vmem>>, vector<16x128xf32>
    %12 = arith.mulf %11, %11 : vector<16x128xf32>
    %cst_4 = arith.constant dense<0.000000e+00> : vector<16xf32>
    %13 = vector.multi_reduction <add>, %12, %cst_4 [1] : vector<16x128xf32> to vector<16xf32>
    %14 = vector.shape_cast %13 : vector<16xf32> to vector<16x1xf32>
    %cst_5 = arith.constant 1.000000e-24 : f32
    %15 = vector.broadcast %cst_5 : f32 to vector<16x1xf32>
    %16 = arith.maximumf %14, %15 : vector<16x1xf32>
    %17 = math.rsqrt %16 : vector<16x1xf32>
    %18 = vector.broadcast %17 : vector<16x1xf32> to vector<16x128xf32>
    %19 = arith.mulf %11, %18 : vector<16x128xf32>
    %c0_6 = arith.constant 0 : index
    %c0_7 = arith.constant 0 : index
    %20 = vector.load %arg2[%c0_6, %c0_7] : memref<16x128xf32, #tpu.memory_space<vmem>>, vector<16x128xf32>
    %21 = arith.mulf %20, %20 : vector<16x128xf32>
    %cst_8 = arith.constant dense<0.000000e+00> : vector<16xf32>
    %22 = vector.multi_reduction <add>, %21, %cst_8 [1] : vector<16x128xf32> to vector<16xf32>
    %23 = vector.shape_cast %22 : vector<16xf32> to vector<16x1xf32>
    %cst_9 = arith.constant 1.000000e-24 : f32
    %24 = vector.broadcast %cst_9 : f32 to vector<16x1xf32>
    %25 = arith.maximumf %23, %24 : vector<16x1xf32>
    %26 = math.rsqrt %25 : vector<16x1xf32>
    %27 = vector.broadcast %26 : vector<16x1xf32> to vector<16x128xf32>
    %28 = arith.mulf %20, %27 : vector<16x128xf32>
    %c0_10 = arith.constant 0 : index
    %c0_11 = arith.constant 0 : index
    %29 = vector.load %arg3[%c0_10, %c0_11] : memref<16x128xf32, #tpu.memory_space<vmem>>, vector<16x128xf32>
    %30 = arith.mulf %29, %29 : vector<16x128xf32>
    %cst_12 = arith.constant dense<0.000000e+00> : vector<16xf32>
    %31 = vector.multi_reduction <add>, %30, %cst_12 [1] : vector<16x128xf32> to vector<16xf32>
    %32 = vector.shape_cast %31 : vector<16xf32> to vector<16x1xf32>
    %cst_13 = arith.constant 1.000000e-24 : f32
    %33 = vector.broadcast %cst_13 : f32 to vector<16x1xf32>
    %34 = arith.maximumf %32, %33 : vector<16x1xf32>
    %35 = math.rsqrt %34 : vector<16x1xf32>
    %36 = vector.broadcast %35 : vector<16x1xf32> to vector<16x128xf32>
    %37 = arith.mulf %29, %36 : vector<16x128xf32>
    %38 = arith.truncf %10 : vector<16x128xf32> to vector<16x128xbf16>
    %39 = arith.truncf %19 : vector<16x128xf32> to vector<16x128xbf16>
    %40 = arith.truncf %28 : vector<16x128xf32> to vector<16x128xbf16>
    %41 = arith.truncf %37 : vector<16x128xf32> to vector<16x128xbf16>
    %42 = tpu.concatenate %38, %39, %40, %41 in 0 : vector<16x128xbf16>, vector<16x128xbf16>, vector<16x128xbf16>, vector<16x128xbf16> -> vector<64x128xbf16>
    %43 = arith.index_cast %1 : i32 to index
    %c0_14 = arith.constant 0 : index
    %44 = vector.load %arg1[%43, %c0_14] : memref<16x128xf32, #tpu.memory_space<vmem>>, vector<8x128xf32>
    %45 = arith.mulf %44, %44 : vector<8x128xf32>
    %cst_15 = arith.constant dense<0.000000e+00> : vector<8xf32>
    %46 = vector.multi_reduction <add>, %45, %cst_15 [1] : vector<8x128xf32> to vector<8xf32>
    %47 = vector.shape_cast %46 : vector<8xf32> to vector<8x1xf32>
    %cst_16 = arith.constant 1.000000e-24 : f32
    %48 = vector.broadcast %cst_16 : f32 to vector<8x1xf32>
    %49 = arith.maximumf %47, %48 : vector<8x1xf32>
    %50 = math.rsqrt %49 : vector<8x1xf32>
    %51 = vector.broadcast %50 : vector<8x1xf32> to vector<8x128xf32>
    %52 = arith.mulf %44, %51 : vector<8x128xf32>
    %53 = arith.index_cast %1 : i32 to index
    %c0_17 = arith.constant 0 : index
    %54 = vector.load %arg4[%53, %c0_17] : memref<16x128xf32, #tpu.memory_space<vmem>>, vector<8x128xf32>
    %55 = arith.mulf %54, %54 : vector<8x128xf32>
    %cst_18 = arith.constant dense<0.000000e+00> : vector<8xf32>
    %56 = vector.multi_reduction <add>, %55, %cst_18 [1] : vector<8x128xf32> to vector<8xf32>
    %57 = vector.shape_cast %56 : vector<8xf32> to vector<8x1xf32>
    %cst_19 = arith.constant 1.000000e-24 : f32
    %58 = vector.broadcast %cst_19 : f32 to vector<8x1xf32>
    %59 = arith.maximumf %57, %58 : vector<8x1xf32>
    %60 = math.rsqrt %59 : vector<8x1xf32>
    %61 = vector.broadcast %60 : vector<8x1xf32> to vector<8x128xf32>
    %62 = arith.mulf %54, %61 : vector<8x128xf32>
    %63 = arith.index_cast %1 : i32 to index
    %c0_20 = arith.constant 0 : index
    %64 = vector.load %arg2[%63, %c0_20] : memref<16x128xf32, #tpu.memory_space<vmem>>, vector<8x128xf32>
    %65 = arith.mulf %64, %64 : vector<8x128xf32>
    %cst_21 = arith.constant dense<0.000000e+00> : vector<8xf32>
    %66 = vector.multi_reduction <add>, %65, %cst_21 [1] : vector<8x128xf32> to vector<8xf32>
    %67 = vector.shape_cast %66 : vector<8xf32> to vector<8x1xf32>
    %cst_22 = arith.constant 1.000000e-24 : f32
    %68 = vector.broadcast %cst_22 : f32 to vector<8x1xf32>
    %69 = arith.maximumf %67, %68 : vector<8x1xf32>
    %70 = math.rsqrt %69 : vector<8x1xf32>
    %71 = vector.broadcast %70 : vector<8x1xf32> to vector<8x128xf32>
    %72 = arith.mulf %64, %71 : vector<8x128xf32>
    %73 = arith.index_cast %1 : i32 to index
    %c0_23 = arith.constant 0 : index
    %74 = vector.load %arg3[%73, %c0_23] : memref<16x128xf32, #tpu.memory_space<vmem>>, vector<8x128xf32>
    %75 = arith.mulf %74, %74 : vector<8x128xf32>
    %cst_24 = arith.constant dense<0.000000e+00> : vector<8xf32>
    %76 = vector.multi_reduction <add>, %75, %cst_24 [1] : vector<8x128xf32> to vector<8xf32>
    %77 = vector.shape_cast %76 : vector<8xf32> to vector<8x1xf32>
    %cst_25 = arith.constant 1.000000e-24 : f32
    %78 = vector.broadcast %cst_25 : f32 to vector<8x1xf32>
    %79 = arith.maximumf %77, %78 : vector<8x1xf32>
    %80 = math.rsqrt %79 : vector<8x1xf32>
    %81 = vector.broadcast %80 : vector<8x1xf32> to vector<8x128xf32>
    %82 = arith.mulf %74, %81 : vector<8x128xf32>
    %cst_26 = arith.constant 1.000000e+01 : f32
    %83 = vector.broadcast %cst_26 : f32 to vector<8x128xf32>
    %84 = arith.mulf %52, %83 : vector<8x128xf32>
    %cst_27 = arith.constant 1.000000e+01 : f32
    %85 = vector.broadcast %cst_27 : f32 to vector<8x128xf32>
    %86 = arith.mulf %62, %85 : vector<8x128xf32>
    %87 = arith.truncf %84 : vector<8x128xf32> to vector<8x128xbf16>
    %88 = arith.truncf %86 : vector<8x128xf32> to vector<8x128xbf16>
    %89 = tpu.concatenate %87, %88 in 0 : vector<8x128xbf16>, vector<8x128xbf16> -> vector<16x128xbf16>
    %cst_28 = arith.constant dense<0.000000e+00> : vector<16x64xf32>
    %90 = tpu.matmul %89, %42, %cst_28 {dimension_numbers = #tpu.dot_dimension_numbers<[1], [1], [0], [0], [0, 0, 1, 0], [], []>} : vector<16x128xbf16>, vector<64x128xbf16>, vector<16x64xf32> -> vector<16x64xf32>
    %91 = tpu.iota {dimensions = array<i32: 0>} : vector<16x64xi32>
    %92 = tpu.iota {dimensions = array<i32: 1>} : vector<16x64xi32>
    %c8_i32_29 = arith.constant 8 : i32
    %93 = vector.broadcast %c8_i32_29 : i32 to vector<16x64xi32>
    %94 = arith.cmpi sge, %91, %93 : vector<16x64xi32>
    %c8_i32_30 = arith.constant 8 : i32
    %95 = vector.broadcast %c8_i32_30 : i32 to vector<16x64xi32>
    %96 = arith.subi %91, %95 : vector<16x64xi32>
    %97 = arith.select %94, %96, %91 : vector<16x64xi1>, vector<16x64xi32>
    %98 = vector.broadcast %1 : i32 to vector<16x64xi32>
    %99 = arith.addi %97, %98 : vector<16x64xi32>
    %100 = arith.cmpi eq, %92, %99 : vector<16x64xi32>
    %c16_i32 = arith.constant 16 : i32
    %101 = vector.broadcast %c16_i32 : i32 to vector<16x64xi32>
    %102 = arith.addi %99, %101 : vector<16x64xi32>
    %103 = arith.cmpi eq, %92, %102 : vector<16x64xi32>
    %104 = arith.ori %100, %103 : vector<16x64xi1>
    %c32_i32 = arith.constant 32 : i32
    %105 = vector.broadcast %c32_i32 : i32 to vector<16x64xi32>
    %106 = arith.addi %99, %105 : vector<16x64xi32>
    %107 = arith.cmpi eq, %92, %106 : vector<16x64xi32>
    %108 = arith.ori %104, %107 : vector<16x64xi1>
    %c48_i32 = arith.constant 48 : i32
    %109 = vector.broadcast %c48_i32 : i32 to vector<16x64xi32>
    %110 = arith.addi %99, %109 : vector<16x64xi32>
    %111 = arith.cmpi eq, %92, %110 : vector<16x64xi32>
    %112 = arith.ori %108, %111 : vector<16x64xi1>
    %113 = math.exp %90 : vector<16x64xf32>
    %cst_31 = arith.constant 0.000000e+00 : f32
    %114 = vector.broadcast %cst_31 : f32 to vector<16x64xf32>
    %115 = arith.select %112, %114, %113 : vector<16x64xi1>, vector<16x64xf32>
    %cst_32 = arith.constant dense<0.000000e+00> : vector<16xf32>
    %116 = vector.multi_reduction <add>, %115, %cst_32 [1] : vector<16x64xf32> to vector<16xf32>
    %117 = vector.shape_cast %116 : vector<16xf32> to vector<16x1xf32>
    %118 = vector.extract_strided_slice %117 {offsets = [0, 0], sizes = [8, 1], strides = [1, 1]} : vector<16x1xf32> to vector<8x1xf32>
    %119 = vector.extract_strided_slice %117 {offsets = [8, 0], sizes = [8, 1], strides = [1, 1]} : vector<16x1xf32> to vector<8x1xf32>
    %120 = arith.mulf %84, %62 : vector<8x128xf32>
    %cst_33 = arith.constant dense<0.000000e+00> : vector<8xf32>
    %121 = vector.multi_reduction <add>, %120, %cst_33 [1] : vector<8x128xf32> to vector<8xf32>
    %122 = vector.shape_cast %121 : vector<8xf32> to vector<8x1xf32>
    %123 = arith.mulf %84, %72 : vector<8x128xf32>
    %cst_34 = arith.constant dense<0.000000e+00> : vector<8xf32>
    %124 = vector.multi_reduction <add>, %123, %cst_34 [1] : vector<8x128xf32> to vector<8xf32>
    %125 = vector.shape_cast %124 : vector<8xf32> to vector<8x1xf32>
    %126 = arith.mulf %84, %82 : vector<8x128xf32>
    %cst_35 = arith.constant dense<0.000000e+00> : vector<8xf32>
    %127 = vector.multi_reduction <add>, %126, %cst_35 [1] : vector<8x128xf32> to vector<8xf32>
    %128 = vector.shape_cast %127 : vector<8xf32> to vector<8x1xf32>
    %129 = arith.mulf %86, %72 : vector<8x128xf32>
    %cst_36 = arith.constant dense<0.000000e+00> : vector<8xf32>
    %130 = vector.multi_reduction <add>, %129, %cst_36 [1] : vector<8x128xf32> to vector<8xf32>
    %131 = vector.shape_cast %130 : vector<8xf32> to vector<8x1xf32>
    %132 = arith.mulf %86, %82 : vector<8x128xf32>
    %cst_37 = arith.constant dense<0.000000e+00> : vector<8xf32>
    %133 = vector.multi_reduction <add>, %132, %cst_37 [1] : vector<8x128xf32> to vector<8xf32>
    %134 = vector.shape_cast %133 : vector<8xf32> to vector<8x1xf32>
    %135 = math.exp %125 : vector<8x1xf32>
    %136 = math.exp %128 : vector<8x1xf32>
    %137 = arith.addf %135, %136 : vector<8x1xf32>
    %138 = math.exp %122 : vector<8x1xf32>
    %139 = arith.addf %137, %138 : vector<8x1xf32>
    %140 = math.exp %131 : vector<8x1xf32>
    %141 = math.exp %134 : vector<8x1xf32>
    %142 = arith.addf %140, %141 : vector<8x1xf32>
    %143 = math.exp %122 : vector<8x1xf32>
    %144 = arith.addf %142, %143 : vector<8x1xf32>
    %145 = arith.addf %139, %118 : vector<8x1xf32>
    %146 = arith.divf %139, %145 : vector<8x1xf32>
    %147 = math.log %146 : vector<8x1xf32>
    %cst_38 = arith.constant 0.000000e+00 : f32
    %148 = vector.broadcast %cst_38 : f32 to vector<8x1xf32>
    %149 = arith.subf %148, %147 : vector<8x1xf32>
    %150 = arith.addf %144, %119 : vector<8x1xf32>
    %151 = arith.divf %144, %150 : vector<8x1xf32>
    %152 = math.log %151 : vector<8x1xf32>
    %153 = arith.subf %149, %152 : vector<8x1xf32>
    %c0_39 = arith.constant 0 : index
    %c0_40 = arith.constant 0 : index
    %154 = vector.load %arg7[%c0_39, %c0_40] : memref<8x1xf32, #tpu.memory_space<vmem>>, vector<8x1xf32>
    tpu.vector_store %arg7[%c0_39, %c0_40], %153 {strides = array<i32>} : memref<8x1xf32, #tpu.memory_space<vmem>>, vector<8x1xf32>,
    %c0_41 = arith.constant 0 : index
    %c0_42 = arith.constant 0 : index
    %155 = vector.load %arg5[%c0_41, %c0_42] : memref<8x1xf32, #tpu.memory_space<vmem>>, vector<8x1xf32>
    %c0_43 = arith.constant 0 : index
    %c0_44 = arith.constant 0 : index
    %156 = vector.load %arg6[%c0_43, %c0_44] : memref<8x1xf32, #tpu.memory_space<vmem>>, vector<8x1xf32>
    %157 = vector.broadcast %155 : vector<8x1xf32> to vector<8x128xf32>
    %158 = arith.mulf %157, %52 : vector<8x128xf32>
    %cst_45 = arith.constant 1.000000e+00 : f32
    %159 = vector.broadcast %cst_45 : f32 to vector<8x1xf32>
    %160 = arith.subf %159, %155 : vector<8x1xf32>
    %161 = vector.broadcast %160 : vector<8x1xf32> to vector<8x128xf32>
    %162 = arith.mulf %161, %62 : vector<8x128xf32>
    %163 = arith.addf %158, %162 : vector<8x128xf32>
    %164 = vector.broadcast %156 : vector<8x1xf32> to vector<8x128xf32>
    %165 = arith.mulf %164, %62 : vector<8x128xf32>
    %cst_46 = arith.constant 1.000000e+00 : f32
    %166 = vector.broadcast %cst_46 : f32 to vector<8x1xf32>
    %167 = arith.subf %166, %156 : vector<8x1xf32>
    %168 = vector.broadcast %167 : vector<8x1xf32> to vector<8x128xf32>
    %169 = arith.mulf %168, %52 : vector<8x128xf32>
    %170 = arith.addf %165, %169 : vector<8x128xf32>
    %171 = arith.subf %72, %163 : vector<8x128xf32>
    %172 = arith.mulf %171, %171 : vector<8x128xf32>
    %cst_47 = arith.constant dense<0.000000e+00> : vector<8xf32>
    %173 = vector.multi_reduction <add>, %172, %cst_47 [1] : vector<8x128xf32> to vector<8xf32>
    %174 = vector.shape_cast %173 : vector<8xf32> to vector<8x1xf32>
    %175 = math.sqrt %174 : vector<8x1xf32>
    %176 = arith.subf %82, %170 : vector<8x128xf32>
    %177 = arith.mulf %176, %176 : vector<8x128xf32>
    %cst_48 = arith.constant dense<0.000000e+00> : vector<8xf32>
    %178 = vector.multi_reduction <add>, %177, %cst_48 [1] : vector<8x128xf32> to vector<8xf32>
    %179 = vector.shape_cast %178 : vector<8xf32> to vector<8x1xf32>
    %180 = math.sqrt %179 : vector<8x1xf32>
    %181 = arith.addf %175, %180 : vector<8x1xf32>
    %c0_49 = arith.constant 0 : index
    %c0_50 = arith.constant 0 : index
    %182 = vector.load %arg8[%c0_49, %c0_50] : memref<8x1xf32, #tpu.memory_space<vmem>>, vector<8x1xf32>
    tpu.vector_store %arg8[%c0_49, %c0_50], %181 {strides = array<i32>} : memref<8x1xf32, #tpu.memory_space<vmem>>, vector<8x1xf32>,
    return
  }
  func.func @transform_0(%arg0: i32) -> (i32, i32) {
    %c0_i32 = arith.constant 0 : i32
    %c0_i32_0 = arith.constant 0 : i32
    %c0_i32_1 = arith.constant 0 : i32
    return %c0_i32, %c0_i32_0 : i32, i32
  }
  func.func @transform_1(%arg0: i32) -> (i32, i32) {
    %c0_i32 = arith.constant 0 : i32
    %c0_i32_0 = arith.constant 0 : i32
    %c0_i32_1 = arith.constant 0 : i32
    return %c0_i32, %c0_i32_0 : i32, i32
  }
  func.func @transform_2(%arg0: i32) -> (i32, i32) {
    %c0_i32 = arith.constant 0 : i32
    %c0_i32_0 = arith.constant 0 : i32
    %c0_i32_1 = arith.constant 0 : i32
    return %c0_i32, %c0_i32_0 : i32, i32
  }
  func.func @transform_3(%arg0: i32) -> (i32, i32) {
    %c0_i32 = arith.constant 0 : i32
    %c0_i32_0 = arith.constant 0 : i32
    %c0_i32_1 = arith.constant 0 : i32
    return %c0_i32, %c0_i32_0 : i32, i32
  }
  func.func @transform_4(%arg0: i32) -> (i32, i32) {
    %c0_i32 = arith.constant 0 : i32
    %c0_i32_0 = arith.constant 0 : i32
    return %arg0, %c0_i32 : i32, i32
  }
  func.func @transform_5(%arg0: i32) -> (i32, i32) {
    %c0_i32 = arith.constant 0 : i32
    %c0_i32_0 = arith.constant 0 : i32
    return %arg0, %c0_i32 : i32, i32
  }
  func.func @transform_6(%arg0: i32) -> (i32, i32) {
    %c0_i32 = arith.constant 0 : i32
    %c0_i32_0 = arith.constant 0 : i32
    return %arg0, %c0_i32 : i32, i32
  }
  func.func @transform_7(%arg0: i32) -> (i32, i32) {
    %c0_i32 = arith.constant 0 : i32
    %c0_i32_0 = arith.constant 0 : i32
    return %arg0, %c0_i32 : i32, i32
  }
}

</mosaic_0001>

<bundles_post_ra>
// kernel: tpu_custom_call.1
= control target key start
LH: loop header
LB: loop body
LE: loop exit
PB: predicated region body
PF: predicated region fallthrough
CT: control target
= control target key end

     0   :  { %13 = vsyncpa [#allocation3], 0  ;;  %s1518_s0 = inlined_call_operand.vmem [shape: f32[16,128], index: 0, kind: input, shape index: {}]   ;;  %s1519_s1 = inlined_call_operand.vmem [shape: f32[16,128], index: 1, kind: input, shape index: {}]   ;;  %s1520_s2 = inlined_call_operand.hbm [shape: f32[16,128], index: 2, kind: input, shape index: {}]   ;;  %s1521_s3 = inlined_call_operand.hbm [shape: f32[16,128], index: 3, kind: input, shape index: {}]   ;;  %s1522_s4 = inlined_call_operand.vmem [shape: f32[16,1], index: 4, kind: input, shape index: {}]   ;;  %s1523_s5 = inlined_call_operand.vmem [shape: f32[16,1], index: 5, kind: input, shape index: {}]   ;;  %s1524_s6 = inlined_call_operand.vmem [shape: f32[16,1], index: 6, kind: output, shape index: {0}]   ;;  %s1525_s7 = inlined_call_operand.vmem [shape: f32[16,1], index: 7, kind: output, shape index: {1}]  }
   0x1   :  { %14 = vsyncpa [#allocation5], 0  ;;  %s1120_s24 = smov 0  }
   0x2 LB: > { %s230_s27 = sshll.u32 %s1520_s2, 4  ;;  %s1129_s28 = sadd.s32 4294967295, %s1073_s24   ;;  %s1073_s24 = sphi %s1120_s24, %s20_s24   ;;  %s231_s27 = int_to_ptr.hbm [resolvable:$true] %s230_s27 }
   0x3   : > { %p899_p0 = scmp.ge.s32.totalorder %s1073_s24, 1  ;;  %p213_p1 = scmp.lt.s32.totalorder %s1073_s24, 3 }
   0x4   : > { %p929_p2 = scmp.eq.s32.totalorder %s1129_s28, 0  ;;  %s1075_s30 = smov [#allocation2]  }
   0x5   : > { %p1134_p3 = pnand %p899_p0, %p213_p1  ;;  %s232_s8 = sshll.u32 %s1075_s30, 4  ;;  %s233_s8 = int_to_ptr.vmem [resolvable:$true] %s232_s8 }
   0x6   : > { %s244_s11 = sshll.u32 %s1521_s3, 4  ;;  %s1076_s12 = smov [#allocation4]   ;;  %s245_s11 = int_to_ptr.hbm [resolvable:$true] %s244_s11 }
   0x7   : > { %p922_p4 = pneg %p1134_p3  ;;  %s246_s13 = sshll.u32 %s1076_s12, 4  ;;  %s247_s13 = int_to_ptr.vmem [resolvable:$true] %s246_s13 }
   0x8   : > { %s1077_s14 = smov 128   ;;  %s1078_s15 = smov 8  }
   0x9   : > { %p923_p5 = pnand %p929_p2, %p922_p4  ;;  %276 = sbr.rel (%p1134_p3) target bundleno = 499 (0x1f3), region = 44 }
   0xb   : > { %925 = dma.hbm_to_vmem [thread:$0]  (!%p923_p5), %s231_s27, 256, %s233_s8, [#allocation3], %s1077_s14, %s1077_s14, %s1078_s15  }
   0xc   : > { %928 = dma.hbm_to_vmem [thread:$0]  (!%p923_p5), %s245_s11, 256, %s247_s13, [#allocation5], %s1077_s14, %s1077_s14, %s1078_s15  }
   0xe   : > { %1064 = dma.done.wait (%p929_p2), [#allocation3], 256  }
   0xf   : > { %1066 = vsyncadd (%p929_p2), [#allocation3], 4294967040 }
  0x10   : > { %1068 = dma.done.wait (%p929_p2), [#allocation5], 256  }
  0x11   : > { %1070 = vsyncadd (%p929_p2), [#allocation5], 4294967040  ;;  %v1079_v0 = vmov 0   ;;  %v1155_v1 = vld [vmem:[#allocation2] sm:$0xff]  ;;  %v1162_v3 = vld [vmem:[#allocation4] sm:$0xff]  ;;  %s1184_s20 = sshll.u32 %s1129_s28, 3 }
  0x12   : > { %946 = vset.pattern.permute.xlu0 %v1079_v0  ;;  %947 = vset.pattern.permute.xlu1 %v1079_v0  ;;  %v1160_v2 = vld [vmem:[%s1519_s1] sm:$0xff]  ;;  %v436_v4 = vmul.f32 %v1155_v1, %v1155_v1  ;;  %v372_v6 = vmul.f32 %v1162_v3, %v1162_v3  ;;  %v1170_v7 = vld [vmem:[#allocation2 + $0x8] sm:$0xff]  ;;  %v1177_v9 = vld [vmem:[#allocation4 + $0x8] sm:$0xff]  ;;  %s515_s26 = scalar_lea.vmem [#allocation4], %s1184_s20  ;;  %s532_s30 = scalar_lea.vmem %s1519_s1, %s1184_s20 }
  0x13   : > { %948 = vset.pattern.permute.xlu2 %v1079_v0  ;;  %v404_v5 = vmul.f32 %v1160_v2, %v1160_v2  ;;  %v1175_v8 = vld [vmem:[%s1519_s1 + $0x8] sm:$0xff]  ;;  %v437_v10 = vmul.f32 %v1170_v7, %v1170_v7  ;;  %v373_v12 = vmul.f32 %v1177_v9, %v1177_v9  ;;  %v1196_v14 = vld [vmem:[%s1518_s0] sm:$0xff]  ;;  %s498_s10 = scalar_lea.vmem %s1518_s0, %s1184_s20  ;;  %s549_s11 = scalar_lea.vmem [#allocation2], %s1184_s20 }
  0x14   : > { %438 = vadd.xlane.f32.xlu0 %v436_v4  ;;  %374 = vadd.xlane.f32.xlu2 %v372_v6  ;;  %v405_v11 = vmul.f32 %v1175_v8, %v1175_v8  ;;  %v1191_v13 = vld [vmem:[%s1518_s0 + $0x8] sm:$0xff]  ;;  %v1199_v15 = vld [vmem:[%s515_s26] sm:$0xff]  ;;  %v340_v17 = vmul.f32 %v1196_v14, %v1196_v14  ;;  %p320_p6 = scmp.lt.s32.totalorder %s1129_s28, 1 }
  0x15   : > { %406 = vadd.xlane.f32.xlu1 %v404_v5  ;;  %v341_v16 = vmul.f32 %v1191_v13, %v1191_v13  ;;  %v517_v18 = vmul.f32 %v1199_v15, %v1199_v15  ;;  %v1215_v19 = vld [vmem:[%s532_s30] sm:$0xff] }
  0x16   : > { %v1217_v20 = vld [vmem:[%s498_s10] sm:$0xff]  ;;  %v534_v22 = vmul.f32 %v1215_v19, %v1215_v19  ;;  %s1550_s28 = smov (!%p320_p6, %s1129_s28), 1 }
  0x17   : > { %v1220_v21 = vld [vmem:[%s549_s11] sm:$0xff]  ;;  %v500_v23 = vmul.f32 %v1217_v20, %v1217_v20  ;;  %s1230_s12 = sshll.u32 %s1550_s28, 3 }
  0x18   : > { %v551_v24 = vmul.f32 %v1220_v21, %v1220_v21  ;;  %s323_s15 = scalar_lea.vmem %s1522_s4, %s1230_s12  ;;  %s327_s18 = scalar_lea.vmem %s1523_s5, %s1230_s12 }
  0x19   : > { %v707_v25 = vld [vmem:[%s323_s15] sm:$0xff]  ;;  %s331_s23 = scalar_lea.vmem %s1524_s6, %s1230_s12 }
  0x1a   : > { %v715_v26 = vsub.f32 1.0, %v707_v25  ;;  %v708_v27 = vld [vmem:[%s327_s18] sm:$0xff] }
  0x1b   : > { %v729_v28 = vsub.f32 1.0, %v708_v27 }
  0x1c   : > { %440 = vadd.xlane.f32.xlu0 %v437_v10  ;;  %376 = vadd.xlane.f32.xlu2 %v373_v12 }
  0x1d   : > { %408 = vadd.xlane.f32.xlu1 %v405_v11 }
  0x24   : > { %342 = vadd.xlane.f32.xlu0 %v340_v17  ;;  %518 = vadd.xlane.f32.xlu2 %v517_v18 }
  0x25   : > { %344 = vadd.xlane.f32.xlu1 %v341_v16 }
  0x2c   : > { %501 = vadd.xlane.f32.xlu0 %v500_v23  ;;  %552 = vadd.xlane.f32.xlu2 %v551_v24 }
  0x2d   : > { %535 = vadd.xlane.f32.xlu1 %v534_v22 }
  0x40   : > { %711 = vperm.xlu0 %946, %v707_v25  }
  0x44   : > { %725 = vperm.xlu2 %948, %v708_v27  }
  0x46   : > { %718 = vperm.xlu1 %947, %v715_v26  }
  0x4c   : > { %732 = vperm.xlu2 %948, %v729_v28  }
  0x87   : > { %v439_v29 = vpop.xlane.xlu0 %438  ;;  %v375_v33 = vpop.xlane.xlu2 %374 }
  0x88   : > { %v407_v30 = vpop.xlane.xlu1 %406  ;;  %v442_v31 = vmax.f32 %v439_v29, 1e-24  ;;  %v1242_v34 = vmax.f32 %v375_v33, 1e-24 }
  0x89   : > { %v1240_v32 = vmax.f32 %v407_v30, 1e-24 }
  0x8a   : > { %949 = vrsqrt.f32 %v442_v31  ;;  %vm450_vm1 = vweird.f32 %v442_v31  ;;  %vm386_vm8 = vweird.f32 %v1242_v34 }
  0x8b   : > { %951 = vrsqrt.f32 %v1240_v32  ;;  %vm418_vm2 = vweird.f32 %v1240_v32 }
  0x8c   : > { %953 = vrsqrt.f32 %v1242_v34 }
  0x8f   : > { %v441_v35 = vpop.xlane.xlu0 %440  ;;  %v377_v40 = vpop.xlane.xlu2 %376 }
  0x90   : > { %v409_v36 = vpop.xlane.xlu1 %408  ;;  %v1246_v37 = vpop.eup %949  ;;  %v1248_v38 = vmax.f32 %v441_v35, 1e-24  ;;  %v1255_v43 = vmax.f32 %v377_v40, 1e-24 }
  0x91   : > { %v1250_v39 = vmax.f32 %v409_v36, 1e-24  ;;  %v1252_v41 = vpop.eup %951  ;;  %v445_v42 = vmul.f32 %v1246_v37, %v442_v31  ;;  %vm451_vm0 = vweird.f32 %v1246_v37 }
  0x92   : > { %v1257_v44 = vpop.eup %953  ;;  %v413_v45 = vmul.f32 %v1252_v41, %v1240_v32  ;;  %955 = vrsqrt.f32 %v1248_v38  ;;  %vm419_vm3 = vweird.f32 %v1252_v41  ;;  %vm1297_vm4 = vmor %vm450_vm1, %vm451_vm0  ;;  %vm460_vm5 = vweird.f32 %v1248_v38 }
  0x93   : > { %v446_v46 = vmul.f32 %v1246_v37, %v445_v42  ;;  %v381_v47 = vmul.f32 %v1257_v44, %v1242_v34  ;;  %957 = vrsqrt.f32 %v1250_v39  ;;  %vm428_vm7 = vweird.f32 %v1250_v39  ;;  %vm1340_vm12 = vmor %vm418_vm2, %vm419_vm3 }
  0x94   : > { %959 = vrsqrt.f32 %v1255_v43  ;;  %v414_v49 = vmul.f32 %v1252_v41, %v413_v45  ;;  %vm387_vm9 = vweird.f32 %v1257_v44  ;;  %vm396_vm11 = vweird.f32 %v1255_v43 }
  0x95   : > { %v447_v48 = vmul.f32 0.5, %v446_v46  ;;  %v382_v50 = vmul.f32 %v1257_v44, %v381_v47 }
  0x96   : > { %v415_v59 = vmul.f32 0.5, %v414_v49 }
  0x97   : > { %v343_v52 = vpop.xlane.xlu0 %342  ;;  %v519_v54 = vpop.xlane.xlu2 %518  ;;  %v448_v58 = vsub.f32 1.5, %v447_v48  ;;  %v383_v0 = vmul.f32 0.5, %v382_v50 }
  0x98   : > { %v345_v51 = vpop.xlane.xlu1 %344  ;;  %v1269_v53 = vpop.eup %955  ;;  %v1273_v56 = vmax.f32 %v343_v52, 1e-24  ;;  %v1279_v61 = vmax.f32 %v519_v54, 1e-24  ;;  %v416_v10 = vsub.f32 1.5, %v415_v59 }
  0x99   : > { %v1271_v55 = vmax.f32 %v345_v51, 1e-24  ;;  %v1275_v57 = vpop.eup %957  ;;  %v455_v60 = vmul.f32 %v1269_v53, %v1248_v38  ;;  %v449_v12 = vmul.f32 %v1246_v37, %v448_v58  ;;  %v384_v22 = vsub.f32 1.5, %v383_v0 }
  0x9a   : > { %v1281_v62 = vpop.eup %959  ;;  %v423_v63 = vmul.f32 %v1275_v57, %v1250_v39  ;;  %vm461_vm6 = vweird.f32 %v1269_v53  ;;  %vm429_vm10 = vweird.f32 %v1275_v57  ;;  %v417_v36 = vmul.f32 %v1252_v41, %v416_v10 }
  0x9b   : > { %961 = vrsqrt.f32 %v1271_v55  ;;  %v456_v4 = vmul.f32 %v1269_v53, %v455_v60  ;;  %v391_v5 = vmul.f32 %v1281_v62, %v1255_v43  ;;  %v453_v29 = vsel %vm1297_vm4, %v1246_v37, %v449_v12  ;;  %vm462_vm15 = vmor %vm460_vm5, %vm461_vm6 }
  0x9c   : > { %963 = vrsqrt.f32 %v1279_v61  ;;  %v424_v6 = vmul.f32 %v1275_v57, %v423_v63  ;;  %v464_v48 = vmul.f32 %v453_v29, %v1155_v1  ;;  %vm397_vm13 = vweird.f32 %v1281_v62  ;;  %vm1367_vm1 = vmor %vm428_vm7, %vm429_vm10 }
  0x9d   : > { %965 = vrsqrt.f32 %v1273_v56  ;;  %v457_v11 = vmul.f32 0.5, %v456_v4  ;;  %v392_v17 = vmul.f32 %v1281_v62, %v391_v5  ;;  %vm527_vm14 = vweird.f32 %v1279_v61  ;;  %vm1398_vm10 = vmor %vm386_vm8, %vm387_vm9 }
  0x9e   : > { %v425_v16 = vmul.f32 0.5, %v424_v6  ;;  %v421_v32 = vsel %vm1340_vm12, %v1252_v41, %v417_v36  ;;  %v1354_v52 = vmul.f32 %v1257_v44, %v384_v22  ;;  %v472_v63 = vpack.c.bf16 %v464_v48, %v464_v48  ;;  %vm1419_vm8 = vmor %vm396_vm11, %vm397_vm13 }
  0x9f   : > { %v502_v24 = vpop.xlane.xlu0 %501  ;;  %v553_v26 = vpop.xlane.xlu2 %552  ;;  %v458_v31 = vsub.f32 1.5, %v457_v11  ;;  %v1325_v45 = vmul.f32 0.5, %v392_v17  ;;  %vm354_vm3 = vweird.f32 %v1273_v56  ;;  %vm364_vm4 = vweird.f32 %v1271_v55 }
  0xa0   : > { %v536_v23 = vpop.xlane.xlu1 %535  ;;  %v1311_v28 = vmax.f32 %v502_v24, 1e-24  ;;  %v1320_v35 = vmax.f32 %v553_v26, 1e-24  ;;  %v426_v42 = vsub.f32 1.5, %v425_v16  ;;  %v494_v29 = vunpack.c.l.b16 %v472_v63 }
  0xa1   : > { %v1304_v25 = vpop.eup %961  ;;  %v1309_v27 = vmax.f32 %v536_v23, 1e-24  ;;  %v459_v1 = vmul.f32 %v1269_v53, %v458_v31  ;;  %v394_v54 = vsub.f32 1.5, %v1325_v45 }
  0xa2   : > { %v1316_v30 = vpop.eup %963  ;;  %v359_v33 = vmul.f32 %v1304_v25, %v1271_v55  ;;  %v427_v59 = vmul.f32 %v1275_v57, %v426_v42  ;;  %vm561_vm6 = vweird.f32 %v1320_v35  ;;  %vm510_vm7 = vweird.f32 %v1311_v28 }
  0xa3   : > { %v1323_v40 = vpop.eup %965  ;;  %v522_v37 = vmul.f32 %v1316_v30, %v1279_v61  ;;  %967 = vrsqrt.f32 %v1309_v27  ;;  %vm528_vm0 = vweird.f32 %v1316_v30  ;;  %vm544_vm2 = vweird.f32 %v1309_v27 }
  0xa4   : > { %v360_v46 = vmul.f32 %v1304_v25, %v359_v33  ;;  %v349_v47 = vmul.f32 %v1323_v40, %v1273_v56  ;;  %969 = vrsqrt.f32 %v1320_v35  ;;  %v463_v38 = vsel %vm462_vm15, %v1269_v53, %v459_v1  ;;  %vm1410_vm12 = vmor %vm527_vm14, %vm528_vm0 }
  0xa5   : > { %v523_v50 = vmul.f32 %v1316_v30, %v522_v37  ;;  %971 = vrsqrt.f32 %v1311_v28  ;;  %v465_v6 = vmul.f32 %v463_v38, %v1170_v7  ;;  %v431_v39 = vsel %vm1367_vm1, %v1275_v57, %v427_v59 }
  0xa6   : > { %v350_v51 = vmul.f32 %v1323_v40, %v349_v47  ;;  %v1371_v60 = vmul.f32 0.5, %v360_v46  ;;  %vm355_vm5 = vweird.f32 %v1323_v40  ;;  %v432_v57 = vmul.f32 %v421_v32, %v1160_v2 }
  0xa7   : > { %v524_v58 = vmul.f32 0.5, %v523_v50  ;;  %v473_v12 = vpack.c.bf16 %v465_v6, %v465_v6  ;;  %v433_v16 = vmul.f32 %v431_v39, %v1175_v8  ;;  %v726_v26 = vpop.permute.xlu2 %725  ;;  %v395_v46 = vmul.f32 %v1281_v62, %v394_v54 }
  0xa8   : > { %v351_v5 = vmul.f32 0.5, %v350_v51  ;;  %v362_v22 = vsub.f32 1.5, %v1371_v60  ;;  %v470_v51 = vpack.c.bf16 %v432_v57, %v432_v57  ;;  %v389_v1 = vsel %vm1398_vm10, %v1257_v44, %v1354_v52 }
  0xa9   : > { %v1375_v0 = vpop.eup %967  ;;  %v525_v4 = vsub.f32 1.5, %v524_v58  ;;  %v495_v31 = vunpack.c.l.b16 %v473_v12  ;;  %v471_v37 = vpack.c.bf16 %v433_v16, %v433_v16  ;;  %vm365_vm15 = vweird.f32 %v1304_v25 }
  0xaa   : > { %v1382_v10 = vpop.eup %969  ;;  %v539_v53 = vmul.f32 %v1375_v0, %v1309_v27  ;;  %v352_v8 = vsub.f32 1.5, %v351_v5  ;;  %vm545_vm14 = vweird.f32 %v1375_v0  ;;  %v363_v60 = vmul.f32 %v1304_v25, %v362_v22 }
  0xab   : > { %v972_v11 = vpop.eup %971  ;;  %v556_v7 = vmul.f32 %v1382_v10, %v1320_v35  ;;  %v526_v18 = vmul.f32 %v1316_v30, %v525_v4  ;;  %vm562_vm9 = vweird.f32 %v1382_v10  ;;  %v496_v45 = vpack.c.b16 %v495_v31, %v494_v29  ;;  %vm1431_vm13 = vmor %vm544_vm2, %vm545_vm14 }
  0xac   : > { %v540_v23 = vmul.f32 %v1375_v0, %v539_v53  ;;  %v505_v24 = vmul.f32 %v972_v11, %v1311_v28  ;;  %vm511_vm11 = vweird.f32 %v972_v11  ;;  %vm1447_vm0 = vmor %vm561_vm6, %vm562_vm9  ;;  %v489_v35 = vunpack.c.l.b16 %v471_v37 }
  0xad   : > { %v557_v34 = vmul.f32 %v1382_v10, %v556_v7  ;;  %v530_v47 = vsel %vm1410_vm12, %v1316_v30, %v526_v18  ;;  %582 = vmatpush.bf16.xpose.msra.mxu0 %v496_v45  ;;  %v399_v30 = vsel %vm1419_vm8, %v1281_v62, %v395_v46  ;;  %vm1456_vm1 = vmor %vm510_vm7, %vm511_vm11  ;;  %v353_v59 = vmul.f32 %v1323_v40, %v352_v8 }
  0xae   : > { %v541_v61 = vmul.f32 0.5, %v540_v23  ;;  %v506_v36 = vmul.f32 %v972_v11, %v505_v24  ;;  %v401_v58 = vmul.f32 %v399_v30, %v1177_v9  ;;  %v531_v52 = vmul.f32 %v530_v47, %v1199_v15  ;;  %vm1466_vm2 = vmor %vm354_vm3, %vm355_vm5 }
  0xaf   : > { %v558_v42 = vmul.f32 0.5, %v557_v34  ;;  %v400_v28 = vmul.f32 %v389_v1, %v1162_v3  ;;  %vm1474_vm6 = vmor %vm364_vm4, %vm365_vm15  ;;  %v488_v38 = vunpack.c.l.b16 %v470_v51  ;;  %v733_v4 = vpop.permute.xlu2 %732  ;;  %v357_v7 = vsel %vm1466_vm2, %v1323_v40, %v353_v59 }
  0xb0   : > { %v542_v43 = vsub.f32 1.5, %v541_v61  ;;  %v507_v48 = vmul.f32 0.5, %v506_v36  ;;  %v469_v6 = vpack.c.bf16 %v401_v58, %v401_v58  ;;  %v728_v55 = vmul.f32 %v726_v26, %v531_v52 }
  0xb1   : > { %v559_v49 = vsub.f32 1.5, %v558_v42  ;;  %v490_v39 = vpack.c.b16 %v489_v35, %v488_v38  ;;  %v368_v23 = vmul.f32 %v357_v7, %v1196_v14  ;;  %vm573_vm3 = vcmask 1043456  }
  0xb2   : > { %v543_v32 = vmul.f32 %v1375_v0, %v542_v43  ;;  %v508_v54 = vsub.f32 1.5, %v507_v48  ;;  %v712_v5 = vpop.permute.xlu0 %711  ;;  %v592_v50 = vlaneseq  ;;  %v602_v1 = vstv %s1184_s20  ;;  %s335_s20 = scalar_lea.vmem %s1525_s7, %s1230_s12 }
  0xb3   : > { %v560_v44 = vmul.f32 %v1382_v10, %v559_v49  ;;  %v466_v31 = vpack.c.bf16 %v368_v23, %v368_v23  ;;  %vm631_vm14 = vcmask 523264  }
  0xb4   : > { %v509_v9 = vmul.f32 %v972_v11, %v508_v54  ;;  %v547_v63 = vsel %vm1431_vm13, %v1375_v0, %v543_v32  ;;  %v468_v0 = vpack.c.bf16 %v400_v28, %v400_v28  ;;  %v593_v51 = vshrl.u32 %v592_v50, 7 }
  0xb5   : > { %v564_v56 = vsel %vm1447_vm0, %v1382_v10, %v560_v44  ;;  %v548_v57 = vmul.f32 %v547_v63, %v1215_v19  ;;  %583 = vmatpush.bf16.xpose.msra.mxu0 %v490_v39  ;;  %v476_v45 = vunpack.c.l.b16 %v466_v31  ;;  %v596_v27 = vand.u32 127, %v592_v50 }
  0xb6   : > { %v513_v3 = vsel %vm1456_vm1, %v972_v11, %v509_v9  ;;  %v565_v10 = vmul.f32 %v564_v56, %v1220_v21  ;;  %v367_v11 = vsel %vm1474_vm6, %v1304_v25, %v363_v60  ;;  %v482_v8 = vunpack.c.l.b16 %v468_v0 }
  0xb7   : > { %v514_v53 = vmul.f32 %v513_v3, %v1217_v20  ;;  %v483_v20 = vunpack.c.l.b16 %v469_v6  ;;  %v369_v21 = vmul.f32 %v367_v11, %v1191_v13  ;;  %v567_v25 = vmul.f32 10.0, %v531_v52 }
  0xb8   : > { %v719_v12 = vpop.permute.xlu1 %718  ;;  %v603_v30 = vadd.s32 %v602_v1, %v593_v51 }
  0xb9   : > { %v735_v16 = vmul.f32 %v733_v4, %v514_v53  ;;  %v714_v17 = vmul.f32 %v712_v5, %v514_v53  ;;  %v721_v18 = vmul.f32 %v719_v12, %v531_v52  ;;  %v566_v22 = vmul.f32 10.0, %v514_v53 }
  0xba   : > { %v484_v29 = vpack.c.b16 %v483_v20, %v482_v8  ;;  %v467_v33 = vpack.c.bf16 %v369_v21, %v369_v21  ;;  %v569_v36 = vpack.c.bf16 %v567_v25, %v567_v25  ;;  %v650_v14 = vmul.f32 %v567_v25, %v565_v10 }
  0xbb   : > { %v736_v24 = vadd.f32 %v735_v16, %v728_v55  ;;  %v644_v40 = vmul.f32 %v566_v22, %v565_v10  ;;  %v641_v26 = vmul.f32 %v566_v22, %v548_v57  ;;  %v722_v2 = vadd.f32 %v721_v18, %v714_v17 }
  0xbc   : > { %v638_v19 = vmul.f32 %v566_v22, %v531_v52  ;;  %v647_v42 = vmul.f32 %v567_v25, %v548_v57  ;;  %v477_v37 = vunpack.c.l.b16 %v467_v33  ;;  %v571_v47 = vunpack.c.l.b16 %v569_v36 }
  0xbd   : > { %645 = vadd.xlane.f32.xlu2 %v644_v40  ;;  %642 = vadd.xlane.f32.xlu1 %v641_v26  ;;  %v753_v34 = vsub.f32 %v565_v10, %v736_v24  ;;  %v737_v61 = vsub.f32 %v548_v57, %v722_v2  ;;  %v568_v43 = vpack.c.bf16 %v566_v22, %v566_v22  ;;  %v607_v32 = vadd.s32 16, %v603_v30 }
  0xbe   : > { %639 = vadd.xlane.f32.xlu0 %v638_v19  ;;  %584 = vmatpush.bf16.xpose.msra.mxu0 %v484_v29  ;;  %v478_v46 = vpack.c.b16 %v477_v37, %v476_v45  ;;  %v572_v48 = vpack.c.b16 %v571_v47, %v571_v47  ;;  %v613_v54 = vadd.s32 32, %v603_v30  ;;  %vm605_vm4 = vcmp.eq.s32.totalorder %v596_v27, %v603_v30 }
  0xbf   : > { %v738_v13 = vmul.f32 %v737_v61, %v737_v61  ;;  %vm609_vm5 = vcmp.eq.s32.totalorder %v596_v27, %v607_v32  ;;  %v619_v44 = vadd.s32 48, %v603_v30  ;;  %v754_v60 = vmul.f32 %v753_v34, %v753_v34 }
  0xc0   : > { %v576_v49 = vsel %vm573_vm3, %v568_v43, %v572_v48  ;;  %vm611_vm7 = vmor %vm605_vm4, %vm609_vm5  ;;  %vm615_vm10 = vcmp.eq.s32.totalorder %v596_v27, %v613_v54 }
  0xc1   : > { %vm617_vm12 = vmor %vm611_vm7, %vm615_vm10  ;;  %vm621_vm8 = vcmp.eq.s32.totalorder %v596_v27, %v619_v44 }
  0xc2   : > { %vm623_vm9 = vmor %vm617_vm12, %vm621_vm8  ;;  %vm705_vm12 = vcmask 7168  }
  0xc5   : > { %651 = vadd.xlane.f32.xlu2 %v650_v14  ;;  %648 = vadd.xlane.f32.xlu1 %v647_v42 }
  0xc6   : > { %739 = vadd.xlane.f32.xlu0 %v738_v13  ;;  %585 = vmatpush.bf16.xpose.msra.mxu0 %v478_v46 }
  0xcd   : > { %586 = vmatmul.bf16.vlgmr.msra.gmra.mxu0 %v576_v49 }
 0x130   : > { %v646_v56 = vpop.xlane.xlu2 %645  ;;  %v643_v63 = vpop.xlane.xlu1 %642 }
 0x131   : > { %v640_v4 = vpop.xlane.xlu0 %639  ;;  %v655_v3 = vmul.f32 1.442695, %v646_v56  ;;  %v653_v5 = vmul.f32 1.442695, %v643_v63 }
 0x132   : > { %v658_v55 = vmul.f32 1.442695, %v640_v4 }
 0x138   : > { %v652_v6 = vpop.xlane.xlu2 %651  ;;  %v649_v39 = vpop.xlane.xlu1 %648 }
 0x139   : > { %v663_v53 = vmul.f32 1.442695, %v652_v6  ;;  %v1498_v7 = vpop.xlane.xlu0 %739  ;;  %v661_v10 = vmul.f32 1.442695, %v649_v39 }
 0x13a   : > { %vm748_vm2 = vcmp.eq.f32.partialorder %v1498_v7, inf  ;;  %vm750_vm7 = vcmp.eq.f32.partialorder %v1498_v7, 0.0 }
 0x14a   : > { %v587_v58 = vpop.f32.mrf.mxu0 }
 0x14b   : > { %v625_v62 = vmul.f32 1.442695, %v587_v58 }
 0x14d   : > { %973 = vpow2.f32 %v625_v62 }
 0x152   : > { %v589_v52 = vpop.f32.mrf.mxu0 }
 0x153   : > { %v974_v35 = vpop.eup %973  ;;  %v627_v59 = vmul.f32 1.442695, %v589_v52 }
 0x154   : > { %v629_v41 = vsel %vm623_vm9, 0.0, %v974_v35 }
 0x155   : > { %975 = vpow2.f32 %v627_v59  ;;  %v632_v9 = vsel %vm631_vm14, %v629_v41, 0.0  ;;  %v751_v59 = vand.u32 2147483648, %v1498_v7 }
 0x156   : > { %633 = vadd.xlane.f32.xlu1 %v632_v9  ;;  %977 = vpow2.f32 %v655_v3 }
 0x157   : > { %979 = vpow2.f32 %v653_v5 }
 0x158   : > { %981 = vpow2.f32 %v658_v55 }
 0x159   : > { %983 = vrsqrt.f32 %v1498_v7 }
 0x15a   : > { %985 = vpow2.f32 %v663_v53 }
 0x15b   : > { %v976_v28 = vpop.eup %975  ;;  %987 = vpow2.f32 %v661_v10 }
 0x15c   : > { %v630_v15 = vsel %vm623_vm9, 0.0, %v976_v28  ;;  %v978_v12 = vpop.eup %977 }
 0x15d   : > { %v635_v38 = vsel %vm631_vm14, %v630_v15, 0.0  ;;  %v980_v57 = vpop.eup %979 }
 0x15e   : > { %755 = vadd.xlane.f32.xlu1 %v754_v60  ;;  %636 = vadd.xlane.f32.xlu2 %v635_v38  ;;  %v657_v0 = vadd.f32 %v980_v57, %v978_v12  ;;  %v982_v11 = vpop.eup %981 }
 0x15f   : > { %v984_v16 = vpop.eup %983 }
 0x160   : > { %v660_v17 = vadd.f32 %v982_v11, %v657_v0  ;;  %v986_v18 = vpop.eup %985  ;;  %v742_v24 = vmul.f32 %v984_v16, %v1498_v7 }
 0x161   : > { %v988_v20 = vpop.eup %987 }
 0x162   : > { %v665_v40 = vadd.f32 %v988_v20, %v986_v18  ;;  %v743_v26 = vmul.f32 %v984_v16, %v742_v24 }
 0x164   : > { %v666_v19 = vadd.f32 %v982_v11, %v665_v40  ;;  %v744_v34 = vmul.f32 0.5, %v743_v26 }
 0x166   : > { %v745_v61 = vsub.f32 1.5, %v744_v34 }
 0x168   : > { %v746_v47 = vmul.f32 %v984_v16, %v745_v61 }
 0x16a   : > { %v747_v27 = vmul.f32 %v746_v47, %v1498_v7 }
 0x16c   : > { %v749_v35 = vsel %vm748_vm2, %v1498_v7, %v747_v27 }
 0x16d   : > { %v752_v56 = vsel %vm750_vm7, %v751_v59, %v749_v35 }
 0x1c9   : > { %v634_v22 = vpop.xlane.xlu1 %633 }
 0x1ca   : > { %v667_v23 = vadd.f32 %v660_v17, %v634_v22 }
 0x1cc   : > { %989 = vrcp.f32 %v667_v23  ;;  %v679_v33 = vand.u32 2147483648, %v667_v23  ;;  %v677_v14 = vand.u32 2147483647, %v667_v23  ;;  %vm673_vm13 = vweird.f32 %v667_v23 }
 0x1ce   : > { %v680_v13 = vor.u32 1.1754944e-38, %v679_v33  ;;  %vm678_vm0 = vcmp.eq.f32.partialorder %v677_v14, 8.507059e+37 }
 0x1d1   : > { %v756_v21 = vpop.xlane.xlu1 %755  ;;  %v637_v2 = vpop.xlane.xlu2 %636 }
 0x1d2   : > { %v990_v8 = vpop.eup %989  ;;  %991 = vrsqrt.f32 %v756_v21  ;;  %v686_v29 = vadd.f32 %v666_v19, %v637_v2  ;;  %vm764_vm4 = vcmp.eq.f32.partialorder %v756_v21, inf  ;;  %v767_v28 = vand.u32 2147483648, %v756_v21 }
 0x1d3   : > { %v669_v25 = vmul.f32 %v990_v8, %v667_v23  ;;  %vm674_vm11 = vweird.f32 %v990_v8  ;;  %vm766_vm10 = vcmp.eq.f32.partialorder %v756_v21, 0.0 }
 0x1d4   : > { %993 = vrcp.f32 %v686_v29  ;;  %vm675_vm15 = vmor %vm673_vm13, %vm674_vm11  ;;  %v698_v54 = vand.u32 2147483648, %v686_v29  ;;  %v696_v44 = vand.u32 2147483647, %v686_v29  ;;  %vm692_vm6 = vweird.f32 %v686_v29 }
 0x1d5   : > { %v670_v31 = vsub.f32 1.0, %v669_v25 }
 0x1d6   : > { %v699_v9 = vor.u32 1.1754944e-38, %v698_v54  ;;  %vm697_vm5 = vcmp.eq.f32.partialorder %v696_v44, 8.507059e+37 }
 0x1d7   : > { %v671_v36 = vmul.f32 %v990_v8, %v670_v31 }
 0x1d8   : > { %v992_v42 = vpop.eup %991 }
 0x1d9   : > { %v672_v45 = vadd.f32 %v990_v8, %v671_v36  ;;  %v758_v37 = vmul.f32 %v992_v42, %v756_v21 }
 0x1da   : > { %v994_v46 = vpop.eup %993 }
 0x1db   : > { %v676_v43 = vsel %vm675_vm15, %v990_v8, %v672_v45  ;;  %v759_v48 = vmul.f32 %v992_v42, %v758_v37  ;;  %v688_v50 = vmul.f32 %v994_v46, %v686_v29  ;;  %vm693_vm1 = vweird.f32 %v994_v46 }
 0x1dc   : > { %v681_v49 = vsel %vm678_vm0, %v680_v13, %v676_v43  ;;  %vm694_vm3 = vmor %vm692_vm6, %vm693_vm1 }
 0x1dd   : > { %v760_v51 = vmul.f32 0.5, %v759_v48  ;;  %v682_v1 = vmul.f32 %v681_v49, %v660_v17  ;;  %v689_v30 = vsub.f32 1.0, %v688_v50 }
 0x1df   : > { %v761_v32 = vsub.f32 1.5, %v760_v51  ;;  %v690_v58 = vmul.f32 %v994_v46, %v689_v30  ;;  %995 = vlog2.f32 %v682_v1 }
 0x1e1   : > { %v762_v62 = vmul.f32 %v992_v42, %v761_v32  ;;  %v691_v52 = vadd.f32 %v994_v46, %v690_v58 }
 0x1e3   : > { %v763_v41 = vmul.f32 %v762_v62, %v756_v21  ;;  %v695_v60 = vsel %vm694_vm3, %v994_v46, %v691_v52 }
 0x1e4   : > { %v700_v38 = vsel %vm697_vm5, %v699_v9, %v695_v60 }
 0x1e5   : > { %v765_v15 = vsel %vm764_vm4, %v756_v21, %v763_v41  ;;  %v701_v4 = vmul.f32 %v700_v38, %v666_v19  ;;  %v996_v5 = vpop.eup %995 }
 0x1e6   : > { %v768_v63 = vsel %vm766_vm10, %v767_v28, %v765_v15  ;;  %v684_v6 = vmul.f32 0.6931472, %v996_v5 }
 0x1e7   : > { %v769_v3 = vadd.f32 %v768_v63, %v752_v56  ;;  %997 = vlog2.f32 %v701_v4 }
 0x1e8   : > { %v685_v39 = vsub.f32 0.0, %v684_v6 }
 0x1e9   : > { %770 = vst.msk [vmem:[%s335_s20] sm:$0xff] %vm705_vm12, %v769_v3 }
 0x1ed   : > { %v998_v55 = vpop.eup %997 }
 0x1ee   : > { %v703_v53 = vmul.f32 0.6931472, %v998_v55 }
 0x1f0   : > { %v704_v7 = vsub.f32 %v685_v39, %v703_v53 }
 0x1f2   : > { %706 = vst.msk [vmem:[%s331_s23] sm:$0xff] %vm705_vm12, %v704_v7 }
 0x1f3 PF: > { %s20_s24 = sadd.s32 1, %s1073_s24  }
 0x1f4   : > { %p17_p7 = scmp.ge.s32.totalorder %s20_s24, 4  }
 0x1f6   :  { %19 = sbr.rel (!%p17_p7) target bundleno = 2 (0x2), region = 102 }
 0x1fb   :  { %804 = vsyncpa [#allocation3], 1 }
 0x1fc   :  { %806 = vsyncpa [#allocation3 + $0x1], 1 }
 0x1fd   :  { %807 = vsyncpa [#allocation5], 1 }

</bundles_post_ra>
